<compile_context>
chip_gen: v5e
topology: v5e:2x2
jax: 0.10.0
libtpu: 0.0.40
codegen_flags: <defaults>
</compile_context>

<pallas_src>
import functools

import jax
import jax.numpy as jnp
from jax import lax
from jax.experimental import pallas as pl
from jax.experimental.pallas import tpu as pltpu

LOG_STD_MAX = 2.0
LOG_STD_MIN = -5.0
HIDDEN = 256


def _round_up(n, m):
    return ((n + m - 1) // m) * m


def _pick_batch_tile(B):
    """Largest MXU-friendly tile that still leaves >=2 grid steps (megacore).

    Tiles are multiples of 128/256 for large B (full MXU rows) and always a
    multiple of 8 (sublane granularity)."""
    for t in (512, 256, 128, 64, 32, 16, 8):
        if B >= 2 * t:
            return t
    return 8


def _actor_kernel(
    x_ref,                      # (tile, K_pad)       bf16
    w1_ref, b1_ref,             # (K_pad, H) bf16 / (1, H) f32
    w2_ref, b2_ref,             # (H, H)     bf16 / (1, H) f32
    w3_ref, b3_ref,             # (H, H)     bf16 / (1, H) f32
    wh_ref, bh_ref,             # fused heads: (H, 2*A_pad) bf16 / (1, 2*A_pad) f32
    out_ref,                    # (tile, 2*A_pad) f32: [mean | log_std]
):
    a_pad = out_ref.shape[-1] // 2

    # fc1 -> relu  (bf16 operands on the MXU, f32 accumulate + f32 VPU math)
    h = jnp.dot(x_ref[...], w1_ref[...], preferred_element_type=jnp.float32)
    h = jnp.maximum(h + b1_ref[...], 0.0)

    # fc2 -> relu
    h = jnp.dot(h.astype(w2_ref.dtype), w2_ref[...],
                preferred_element_type=jnp.float32)
    h = jnp.maximum(h + b2_ref[...], 0.0)

    # fc3 -> relu
    h = jnp.dot(h.astype(w3_ref.dtype), w3_ref[...],
                preferred_element_type=jnp.float32)
    h = jnp.maximum(h + b3_ref[...], 0.0)

    # fused heads: one (H, 2*A_pad) matmul.  Lanes [0, a_pad) carry the mean
    # (identity); lanes [a_pad, 2*a_pad) carry raw log_std (tanh + affine).
    head = jnp.dot(h.astype(wh_ref.dtype), wh_ref[...],
                   preferred_element_type=jnp.float32) + bh_ref[...]

    t = jnp.tanh(head)          # EUP; result on mean lanes is discarded below
    logstd_all = LOG_STD_MIN + 0.5 * (LOG_STD_MAX - LOG_STD_MIN) * (t + 1.0)

    lane = lax.broadcasted_iota(jnp.int32, head.shape, dimension=1)
    out = jnp.where(lane >= a_pad, logstd_all, head)

    out_ref[...] = out.astype(out_ref.dtype)   # single lane-dense 2*A_pad store


@functools.partial(jax.jit, static_argnames=("batch_tile",))
def actor_forward(x, params, batch_tile=None):
    """Pallas implementation of ActorWithLambda.forward.

    x: (B, obs_dim_plus_1) float32
    params: dict of weights (in, out) and biases (1, out)
    returns (mean, log_std), each (B, act_dim) float32
    """
    B, d_in = x.shape
    H = params["w1"].shape[1]
    act_dim = params["wm"].shape[1]

    if batch_tile is None:
        batch_tile = _pick_batch_tile(B)

    K_pad = _round_up(d_in, 128)          # lane-aligned K for fc1
    A_pad = _round_up(act_dim, 128)       # lane-dense lanes per head
    B_pad = _round_up(B, batch_tile)      # whole tiles only
    n_tiles = B_pad // batch_tile

    f32 = jnp.float32
    bf16 = jnp.bfloat16

    # --- wrapper-side prep: pad + cast MXU operands, fuse the two heads ----
    x_p = jnp.zeros((B_pad, K_pad), bf16).at[:B, :d_in].set(x.astype(bf16))

    w1_p = jnp.zeros((K_pad, H), bf16).at[:d_in, :].set(params["w1"].astype(bf16))
    w2_p = params["w2"].astype(bf16)
    w3_p = params["w3"].astype(bf16)

    wh = jnp.zeros((H, 2 * A_pad), f32)
    wh = wh.at[:, :act_dim].set(params["wm"])
    wh = wh.at[:, A_pad:A_pad + act_dim].set(params["wl"])
    wh_p = wh.astype(bf16)

    bh = jnp.zeros((1, 2 * A_pad), f32)
    bh = bh.at[:, :act_dim].set(params["bm"].reshape(1, -1))
    bh = bh.at[:, A_pad:A_pad + act_dim].set(params["bl"].reshape(1, -1))

    b1 = params["b1"].reshape(1, H).astype(f32)
    b2 = params["b2"].reshape(1, H).astype(f32)
    b3 = params["b3"].reshape(1, H).astype(f32)

    # grid-invariant spec: block index never changes, so the operand is DMA'd
    # once and stays resident in VMEM across batch tiles.
    def const_spec(shape):
        return pl.BlockSpec(shape, lambda i: (0,) * len(shape))

    in_specs = [
        pl.BlockSpec((batch_tile, K_pad), lambda i: (i, 0)),     # x tile
        const_spec((K_pad, H)), const_spec((1, H)),              # fc1
        const_spec((H, H)),     const_spec((1, H)),              # fc2
        const_spec((H, H)),     const_spec((1, H)),              # fc3
        const_spec((H, 2 * A_pad)), const_spec((1, 2 * A_pad)),  # fused heads
    ]
    out_specs = pl.BlockSpec((batch_tile, 2 * A_pad), lambda i: (i, 0))

    fused = pl.pallas_call(
        _actor_kernel,
        out_shape=jax.ShapeDtypeStruct((B_pad, 2 * A_pad), f32),
        grid_spec=pltpu.PrefetchScalarGridSpec(
            num_scalar_prefetch=0,
            grid=(n_tiles,),
            in_specs=in_specs,
            out_specs=out_specs,
        ),
        compiler_params=pltpu.CompilerParams(
            dimension_semantics=("parallel",),
        ),
    )(
        x_p,
        w1_p, b1,
        w2_p, b2,
        w3_p, b3,
        wh_p, bh,
    )

    mean = fused[:B, :act_dim]
    log_std = fused[:B, A_pad:A_pad + act_dim]
    return mean, log_std


def init_params(key, obs_dim_plus_1, act_dim):
    """Deterministic synthetic init matching nn.Linear shapes
    (stored transposed as (in, out) for x @ W)."""
    ks = jax.random.split(key, 10)

    def linear(kw, kb, fan_in, fan_out):
        bound = 1.0 / jnp.sqrt(fan_in)
        w = jax.random.uniform(kw, (fan_in, fan_out), jnp.float32, -bound, bound)
        b = jax.random.uniform(kb, (1, fan_out), jnp.float32, -bound, bound)
        return w, b

    w1, b1 = linear(ks[0], ks[1], obs_dim_plus_1, HIDDEN)
    w2, b2 = linear(ks[2], ks[3], HIDDEN, HIDDEN)
    w3, b3 = linear(ks[4], ks[5], HIDDEN, HIDDEN)
    wm, bm = linear(ks[6], ks[7], HIDDEN, act_dim)
    wl, bl = linear(ks[8], ks[9], HIDDEN, act_dim)
    return dict(w1=w1, b1=b1, w2=w2, b2=b2, w3=w3, b3=b3,
                wm=wm, bm=bm, wl=wl, bl=bl)


def actor_forward_ref(x, params):
    """Plain-JAX f32 reference (mirrors the PyTorch forward exactly)."""
    h = jax.nn.relu(x @ params["w1"] + params["b1"])
    h = jax.nn.relu(h @ params["w2"] + params["b2"])
    h = jax.nn.relu(h @ params["w3"] + params["b3"])
    mean = h @ params["wm"] + params["bm"]
    log_std = jnp.tanh(h @ params["wl"] + params["bl"])
    log_std = LOG_STD_MIN + 0.5 * (LOG_STD_MAX - LOG_STD_MIN) * (log_std + 1.0)
    return mean, log_std


if __name__ == "__main__":
    # small shapes consistent with the module: obs_dim=16 (+1 for lambda), 6 actions
    B = 16                       # gives 2 grid steps with the auto tile (8)
    OBS_DIM_PLUS_1 = 17
    ACT_DIM = 6

    key = jax.random.PRNGKey(0)
    k_params, k_x = jax.random.split(key)

    params = init_params(k_params, OBS_DIM_PLUS_1, ACT_DIM)
    x = jax.random.normal(k_x, (B, OBS_DIM_PLUS_1), jnp.float32)

    mean, log_std = actor_forward(x, params)
    jax.block_until_ready((mean, log_std))

    mean_ref, log_std_ref = actor_forward_ref(x, params)
    assert mean.shape == (B, ACT_DIM) and log_std.shape == (B, ACT_DIM)
    # bf16 MXU operands (f32 accumulate) -> relaxed tolerance vs f32 reference
    assert jnp.allclose(mean, mean_ref, atol=5e-2, rtol=5e-2)
    assert jnp.allclose(log_std, log_std_ref, atol=5e-2, rtol=5e-2)
    # log_std must lie in [LOG_STD_MIN, LOG_STD_MAX] by construction
    assert bool(jnp.all(log_std >= LOG_STD_MIN)) and bool(jnp.all(log_std <= LOG_STD_MAX))

    print("KERNEL_OK")
</pallas_src>

<mosaic_0001>
module attributes {stable_mosaic.version = 11 : i64} {
  func.func @_actor_kernel(%arg0: i32, %arg1: memref<8x128xbf16, #tpu.memory_space<vmem>>, %arg2: memref<128x256xbf16, #tpu.memory_space<vmem>>, %arg3: memref<1x256xf32, #tpu.memory_space<vmem>>, %arg4: memref<256x256xbf16, #tpu.memory_space<vmem>>, %arg5: memref<1x256xf32, #tpu.memory_space<vmem>>, %arg6: memref<256x256xbf16, #tpu.memory_space<vmem>>, %arg7: memref<1x256xf32, #tpu.memory_space<vmem>>, %arg8: memref<256x256xbf16, #tpu.memory_space<vmem>>, %arg9: memref<1x256xf32, #tpu.memory_space<vmem>>, %arg10: memref<8x256xf32, #tpu.memory_space<vmem>>) attributes {dimension_semantics = [#tpu.dimension_semantics<parallel>], iteration_bounds = array<i64: 2>, scalar_prefetch = 0 : i64, scratch_operands = 0 : i64, tpu.core_type = #tpu.core_type<tc>, window_params = [{transform_indices = @transform_0, window_bounds = array<i64: 8, 128>}, {pipeline_mode = #tpu.pipeline_mode<synchronous>, transform_indices = @transform_1, window_bounds = array<i64: 128, 256>}, {pipeline_mode = #tpu.pipeline_mode<synchronous>, transform_indices = @transform_2, window_bounds = array<i64: 1, 256>}, {pipeline_mode = #tpu.pipeline_mode<synchronous>, transform_indices = @transform_3, window_bounds = array<i64: 256, 256>}, {pipeline_mode = #tpu.pipeline_mode<synchronous>, transform_indices = @transform_4, window_bounds = array<i64: 1, 256>}, {pipeline_mode = #tpu.pipeline_mode<synchronous>, transform_indices = @transform_5, window_bounds = array<i64: 256, 256>}, {pipeline_mode = #tpu.pipeline_mode<synchronous>, transform_indices = @transform_6, window_bounds = array<i64: 1, 256>}, {pipeline_mode = #tpu.pipeline_mode<synchronous>, transform_indices = @transform_7, window_bounds = array<i64: 256, 256>}, {pipeline_mode = #tpu.pipeline_mode<synchronous>, transform_indices = @transform_8, window_bounds = array<i64: 1, 256>}, {transform_indices = @transform_9, window_bounds = array<i64: 8, 256>}]} {
    %c0 = arith.constant 0 : index
    %c0_0 = arith.constant 0 : index
    %0 = vector.load %arg1[%c0, %c0_0] : memref<8x128xbf16, #tpu.memory_space<vmem>>, vector<8x128xbf16>
    %c0_1 = arith.constant 0 : index
    %c0_2 = arith.constant 0 : index
    %1 = vector.load %arg2[%c0_1, %c0_2] : memref<128x256xbf16, #tpu.memory_space<vmem>>, vector<128x256xbf16>
    %cst = arith.constant dense<0.000000e+00> : vector<8x256xf32>
    %2 = tpu.matmul %0, %1, %cst {dimension_numbers = #tpu.dot_dimension_numbers<[1], [0], [0], [1], [0, 0, 1, 1], [], []>} : vector<8x128xbf16>, vector<128x256xbf16>, vector<8x256xf32> -> vector<8x256xf32>
    %c0_3 = arith.constant 0 : index
    %c0_4 = arith.constant 0 : index
    %3 = vector.load %arg3[%c0_3, %c0_4] : memref<1x256xf32, #tpu.memory_space<vmem>>, vector<1x256xf32>
    %4 = vector.broadcast %3 : vector<1x256xf32> to vector<8x256xf32>
    %5 = arith.addf %2, %4 : vector<8x256xf32>
    %cst_5 = arith.constant 0.000000e+00 : f32
    %6 = vector.broadcast %cst_5 : f32 to vector<8x256xf32>
    %7 = arith.maximumf %5, %6 : vector<8x256xf32>
    %8 = arith.truncf %7 : vector<8x256xf32> to vector<8x256xbf16>
    %c0_6 = arith.constant 0 : index
    %c0_7 = arith.constant 0 : index
    %9 = vector.load %arg4[%c0_6, %c0_7] : memref<256x256xbf16, #tpu.memory_space<vmem>>, vector<256x256xbf16>
    %cst_8 = arith.constant dense<0.000000e+00> : vector<8x256xf32>
    %10 = tpu.matmul %8, %9, %cst_8 {dimension_numbers = #tpu.dot_dimension_numbers<[1], [0], [0], [1], [0, 0, 1, 1], [], []>} : vector<8x256xbf16>, vector<256x256xbf16>, vector<8x256xf32> -> vector<8x256xf32>
    %c0_9 = arith.constant 0 : index
    %c0_10 = arith.constant 0 : index
    %11 = vector.load %arg5[%c0_9, %c0_10] : memref<1x256xf32, #tpu.memory_space<vmem>>, vector<1x256xf32>
    %12 = vector.broadcast %11 : vector<1x256xf32> to vector<8x256xf32>
    %13 = arith.addf %10, %12 : vector<8x256xf32>
    %cst_11 = arith.constant 0.000000e+00 : f32
    %14 = vector.broadcast %cst_11 : f32 to vector<8x256xf32>
    %15 = arith.maximumf %13, %14 : vector<8x256xf32>
    %16 = arith.truncf %15 : vector<8x256xf32> to vector<8x256xbf16>
    %c0_12 = arith.constant 0 : index
    %c0_13 = arith.constant 0 : index
    %17 = vector.load %arg6[%c0_12, %c0_13] : memref<256x256xbf16, #tpu.memory_space<vmem>>, vector<256x256xbf16>
    %cst_14 = arith.constant dense<0.000000e+00> : vector<8x256xf32>
    %18 = tpu.matmul %16, %17, %cst_14 {dimension_numbers = #tpu.dot_dimension_numbers<[1], [0], [0], [1], [0, 0, 1, 1], [], []>} : vector<8x256xbf16>, vector<256x256xbf16>, vector<8x256xf32> -> vector<8x256xf32>
    %c0_15 = arith.constant 0 : index
    %c0_16 = arith.constant 0 : index
    %19 = vector.load %arg7[%c0_15, %c0_16] : memref<1x256xf32, #tpu.memory_space<vmem>>, vector<1x256xf32>
    %20 = vector.broadcast %19 : vector<1x256xf32> to vector<8x256xf32>
    %21 = arith.addf %18, %20 : vector<8x256xf32>
    %cst_17 = arith.constant 0.000000e+00 : f32
    %22 = vector.broadcast %cst_17 : f32 to vector<8x256xf32>
    %23 = arith.maximumf %21, %22 : vector<8x256xf32>
    %24 = arith.truncf %23 : vector<8x256xf32> to vector<8x256xbf16>
    %c0_18 = arith.constant 0 : index
    %c0_19 = arith.constant 0 : index
    %25 = vector.load %arg8[%c0_18, %c0_19] : memref<256x256xbf16, #tpu.memory_space<vmem>>, vector<256x256xbf16>
    %cst_20 = arith.constant dense<0.000000e+00> : vector<8x256xf32>
    %26 = tpu.matmul %24, %25, %cst_20 {dimension_numbers = #tpu.dot_dimension_numbers<[1], [0], [0], [1], [0, 0, 1, 1], [], []>} : vector<8x256xbf16>, vector<256x256xbf16>, vector<8x256xf32> -> vector<8x256xf32>
    %c0_21 = arith.constant 0 : index
    %c0_22 = arith.constant 0 : index
    %27 = vector.load %arg9[%c0_21, %c0_22] : memref<1x256xf32, #tpu.memory_space<vmem>>, vector<1x256xf32>
    %28 = vector.broadcast %27 : vector<1x256xf32> to vector<8x256xf32>
    %29 = arith.addf %26, %28 : vector<8x256xf32>
    %30 = math.tanh %29 : vector<8x256xf32>
    %cst_23 = arith.constant 1.000000e+00 : f32
    %31 = vector.broadcast %cst_23 : f32 to vector<8x256xf32>
    %32 = arith.addf %30, %31 : vector<8x256xf32>
    %cst_24 = arith.constant 3.500000e+00 : f32
    %33 = vector.broadcast %cst_24 : f32 to vector<8x256xf32>
    %34 = arith.mulf %33, %32 : vector<8x256xf32>
    %cst_25 = arith.constant -5.000000e+00 : f32
    %35 = vector.broadcast %cst_25 : f32 to vector<8x256xf32>
    %36 = arith.addf %35, %34 : vector<8x256xf32>
    %37 = tpu.iota {dimensions = array<i32: 1>} : vector<8x256xi32>
    %c128_i32 = arith.constant 128 : i32
    %38 = vector.broadcast %c128_i32 : i32 to vector<8x256xi32>
    %39 = arith.cmpi sge, %37, %38 : vector<8x256xi32>
    %40 = arith.select %39, %36, %29 : vector<8x256xi1>, vector<8x256xf32>
    %c0_26 = arith.constant 0 : index
    %c0_27 = arith.constant 0 : index
    %41 = vector.load %arg10[%c0_26, %c0_27] : memref<8x256xf32, #tpu.memory_space<vmem>>, vector<8x256xf32>
    tpu.vector_store %arg10[%c0_26, %c0_27], %40 {strides = array<i32>} : memref<8x256xf32, #tpu.memory_space<vmem>>, vector<8x256xf32>,
    return
  }
  func.func @transform_0(%arg0: i32) -> (i32, i32) {
    %c0_i32 = arith.constant 0 : i32
    %c0_i32_0 = arith.constant 0 : i32
    return %arg0, %c0_i32 : i32, i32
  }
  func.func @transform_1(%arg0: i32) -> (i32, i32) {
    %c0_i32 = arith.constant 0 : i32
    %c0_i32_0 = arith.constant 0 : i32
    %c0_i32_1 = arith.constant 0 : i32
    return %c0_i32, %c0_i32_0 : i32, i32
  }
  func.func @transform_2(%arg0: i32) -> (i32, i32) {
    %c0_i32 = arith.constant 0 : i32
    %c0_i32_0 = arith.constant 0 : i32
    %c0_i32_1 = arith.constant 0 : i32
    return %c0_i32, %c0_i32_0 : i32, i32
  }
  func.func @transform_3(%arg0: i32) -> (i32, i32) {
    %c0_i32 = arith.constant 0 : i32
    %c0_i32_0 = arith.constant 0 : i32
    %c0_i32_1 = arith.constant 0 : i32
    return %c0_i32, %c0_i32_0 : i32, i32
  }
  func.func @transform_4(%arg0: i32) -> (i32, i32) {
    %c0_i32 = arith.constant 0 : i32
    %c0_i32_0 = arith.constant 0 : i32
    %c0_i32_1 = arith.constant 0 : i32
    return %c0_i32, %c0_i32_0 : i32, i32
  }
  func.func @transform_5(%arg0: i32) -> (i32, i32) {
    %c0_i32 = arith.constant 0 : i32
    %c0_i32_0 = arith.constant 0 : i32
    %c0_i32_1 = arith.constant 0 : i32
    return %c0_i32, %c0_i32_0 : i32, i32
  }
  func.func @transform_6(%arg0: i32) -> (i32, i32) {
    %c0_i32 = arith.constant 0 : i32
    %c0_i32_0 = arith.constant 0 : i32
    %c0_i32_1 = arith.constant 0 : i32
    return %c0_i32, %c0_i32_0 : i32, i32
  }
  func.func @transform_7(%arg0: i32) -> (i32, i32) {
    %c0_i32 = arith.constant 0 : i32
    %c0_i32_0 = arith.constant 0 : i32
    %c0_i32_1 = arith.constant 0 : i32
    return %c0_i32, %c0_i32_0 : i32, i32
  }
  func.func @transform_8(%arg0: i32) -> (i32, i32) {
    %c0_i32 = arith.constant 0 : i32
    %c0_i32_0 = arith.constant 0 : i32
    %c0_i32_1 = arith.constant 0 : i32
    return %c0_i32, %c0_i32_0 : i32, i32
  }
  func.func @transform_9(%arg0: i32) -> (i32, i32) {
    %c0_i32 = arith.constant 0 : i32
    %c0_i32_0 = arith.constant 0 : i32
    return %arg0, %c0_i32 : i32, i32
  }
}

</mosaic_0001>

<bundles_post_ra>
// kernel: actor_forward.1
= control target key start
LH: loop header
LB: loop body
LE: loop exit
PB: predicated region body
PF: predicated region fallthrough
CT: control target
= control target key end

     0   :  { %s1932_s30 = smov 0   ;;  %s2647_s0 = inlined_call_operand.vmem [shape: bf16[16,128], index: 0, kind: input, shape index: {}]   ;;  %s2648_s1 = inlined_call_operand.vmem [shape: bf16[128,256], index: 1, kind: input, shape index: {}]   ;;  %s2649_s2 = inlined_call_operand.vmem [shape: f32[1,256], index: 2, kind: input, shape index: {}]   ;;  %s2650_s3 = inlined_call_operand.vmem [shape: bf16[256,256], index: 3, kind: input, shape index: {}]   ;;  %s2651_s4 = inlined_call_operand.vmem [shape: f32[1,256], index: 4, kind: input, shape index: {}]   ;;  %s2652_s5 = inlined_call_operand.vmem [shape: bf16[256,256], index: 5, kind: input, shape index: {}]   ;;  %s2653_s6 = inlined_call_operand.vmem [shape: f32[1,256], index: 6, kind: input, shape index: {}]   ;;  %s2654_s7 = inlined_call_operand.vmem [shape: bf16[256,256], index: 7, kind: input, shape index: {}]   ;;  %s2655_s8 = inlined_call_operand.vmem [shape: f32[1,256], index: 8, kind: input, shape index: {}]   ;;  %s2656_s9 = inlined_call_operand.vmem [shape: f32[16,256], index: 9, kind: output, shape index: {}]  }
   0x1 LB: > { %s1293_s10 = sadd.s32 4294967295, %s1880_s30   ;;  %p1297_p0 = scmp.ge.s32.totalorder %s1880_s30, 1  ;;  %s1880_s30 = sphi %s1932_s30, %s19_s30  }
   0x2   : > { %p286_p1 = scmp.lt.s32.totalorder %s1880_s30, 3 }
   0x4   : > { %p287_p2 = pnand %p1297_p0, %p286_p1 }
   0x5   : > { %p2038_p3 = scmp.lt.s32.totalorder (!%p287_p2), %s1293_s10, 1 }
   0x6   : > { %290 = sbr.rel (%p287_p2) target bundleno = 601 (0x259), region = 56 }
   0xb   : > { %v1359_v0 = vld [vmem:[%s2648_s1 + $0x70] sm:$0xf]  ;;  %v1767_v1 = vld [vmem:[%s2648_s1 + $0x74] sm:$0xf0]  ;;  %v1766_v2 = vld [vmem:[%s2648_s1 + $0x74] sm:$0xf] }
   0xc   : > { %v1360_v3 = vor.u32 %v1767_v1, %v1359_v0  ;;  %v1361_v4 = vld [vmem:[%s2648_s1 + $0x78] sm:$0xf0]  ;;  %v1351_v5 = vld [vmem:[%s2648_s1 + $0x60] sm:$0xf]  ;;  %v1765_v6 = vld [vmem:[%s2648_s1 + $0x64] sm:$0xf0] }
   0xd   : > { %v1364_v7 = vor.u32 %v1766_v2, %v1361_v4  ;;  %v1764_v8 = vld [vmem:[%s2648_s1 + $0x64] sm:$0xf]  ;;  %v1353_v9 = vld [vmem:[%s2648_s1 + $0x68] sm:$0xf0]  ;;  %v1352_v10 = vor.u32 %v1765_v6, %v1351_v5  ;;  %v1343_v12 = vld [vmem:[%s2648_s1 + $0x50] sm:$0xf] }
   0xe   : > { %433 = vmatpush.bf16.msra.mxu0 %v1360_v3  ;;  %v1356_v11 = vor.u32 %v1764_v8, %v1353_v9  ;;  %v1763_v13 = vld [vmem:[%s2648_s1 + $0x54] sm:$0xf0]  ;;  %v1762_v14 = vld [vmem:[%s2648_s1 + $0x54] sm:$0xf]  ;;  %v1345_v15 = vld [vmem:[%s2648_s1 + $0x58] sm:$0xf0] }
   0xf   : > { %446 = vmatpush.bf16.msra.mxu1 %v1364_v7  ;;  %v1344_v16 = vor.u32 %v1763_v13, %v1343_v12  ;;  %v1348_v17 = vor.u32 %v1762_v14, %v1345_v15  ;;  %v1335_v18 = vld [vmem:[%s2648_s1 + $0x40] sm:$0xf]  ;;  %v1761_v19 = vld [vmem:[%s2648_s1 + $0x44] sm:$0xf0]  ;;  %v1760_v20 = vld [vmem:[%s2648_s1 + $0x44] sm:$0xf] }
  0x10   : > { %v1337_v21 = vld [vmem:[%s2648_s1 + $0x48] sm:$0xf0]  ;;  %v1336_v22 = vor.u32 %v1761_v19, %v1335_v18  ;;  %v1423_v23 = vld [vmem:[%s2650_s3 + $0x70] sm:$0xf]  ;;  %v1783_v24 = vld [vmem:[%s2650_s3 + $0x74] sm:$0xf0] }
  0x11   : > { %v1487_v25 = vld [vmem:[%s2650_s3 + $0xf0] sm:$0xf]  ;;  %v1340_v26 = vor.u32 %v1760_v20, %v1337_v21  ;;  %v1759_v28 = vld [vmem:[%s2648_s1 + $0x34] sm:$0xf0]  ;;  %v1424_v29 = vor.u32 %v1783_v24, %v1423_v23  ;;  %v1758_v31 = vld [vmem:[%s2648_s1 + $0x34] sm:$0xf] }
  0x12   : > { %434 = vmatpush.bf16.msra.mxu0 %v1352_v10  ;;  %v1327_v27 = vld [vmem:[%s2648_s1 + $0x30] sm:$0xf]  ;;  %v1799_v30 = vld [vmem:[%s2650_s3 + $0xf4] sm:$0xf0]  ;;  %v1329_v32 = vld [vmem:[%s2648_s1 + $0x38] sm:$0xf0] }
  0x13   : > { %447 = vmatpush.bf16.msra.mxu1 %v1356_v11  ;;  %v1488_v33 = vor.u32 %v1799_v30, %v1487_v25  ;;  %661 = vmatpush.bf16.msra.mxu2 %v1424_v29  ;;  %v1415_v34 = vld [vmem:[%s2650_s3 + $0x60] sm:$0xf]  ;;  %v1781_v35 = vld [vmem:[%s2650_s3 + $0x64] sm:$0xf0]  ;;  %v1328_v36 = vor.u32 %v1759_v28, %v1327_v27  ;;  %v1332_v41 = vor.u32 %v1758_v31, %v1329_v32  ;;  %v1756_v43 = vld [vmem:[%s2648_s1 + $0x24] sm:$0xf] }
  0x14   : > { %v1319_v37 = vld [vmem:[%s2648_s1 + $0x20] sm:$0xf]  ;;  %v1416_v38 = vor.u32 %v1781_v35, %v1415_v34  ;;  %v1797_v40 = vld [vmem:[%s2650_s3 + $0xe4] sm:$0xf0]  ;;  %v1321_v44 = vld [vmem:[%s2648_s1 + $0x28] sm:$0xf0] }
  0x15   : > { %674 = vmatpush.bf16.msra.mxu3 %v1488_v33  ;;  %v1479_v39 = vld [vmem:[%s2650_s3 + $0xe0] sm:$0xf]  ;;  %v1757_v42 = vld [vmem:[%s2648_s1 + $0x24] sm:$0xf0]  ;;  %v1407_v46 = vld [vmem:[%s2650_s3 + $0x50] sm:$0xf]  ;;  %v1324_v56 = vor.u32 %v1756_v43, %v1321_v44 }
  0x16   : > { %435 = vmatpush.bf16.msra.mxu0 %v1344_v16  ;;  %v1480_v45 = vor.u32 %v1797_v40, %v1479_v39  ;;  %v1779_v47 = vld [vmem:[%s2650_s3 + $0x54] sm:$0xf0]  ;;  %v1471_v49 = vld [vmem:[%s2650_s3 + $0xd0] sm:$0xf]  ;;  %v1320_v51 = vor.u32 %v1757_v42, %v1319_v37  ;;  %v1754_v54 = vld [vmem:[%s2648_s1 + $0x14] sm:$0xf] }
  0x17   : > { %448 = vmatpush.bf16.msra.mxu1 %v1348_v17  ;;  %662 = vmatpush.bf16.msra.mxu2 %v1416_v38  ;;  %v1408_v48 = vor.u32 %v1779_v47, %v1407_v46  ;;  %v1795_v50 = vld [vmem:[%s2650_s3 + $0xd4] sm:$0xf0]  ;;  %v1311_v52 = vld [vmem:[%s2648_s1 + $0x10] sm:$0xf]  ;;  %v1399_v57 = vld [vmem:[%s2650_s3 + $0x40] sm:$0xf] }
  0x18   : > { %v1755_v53 = vld [vmem:[%s2648_s1 + $0x14] sm:$0xf0]  ;;  %v1472_v55 = vor.u32 %v1795_v50, %v1471_v49  ;;  %v1777_v58 = vld [vmem:[%s2650_s3 + $0x44] sm:$0xf0]  ;;  %v1463_v59 = vld [vmem:[%s2650_s3 + $0xc0] sm:$0xf] }
  0x19   : > { %675 = vmatpush.bf16.msra.mxu3 %v1480_v45  ;;  %v1313_v60 = vld [vmem:[%s2648_s1 + $0x18] sm:$0xf0]  ;;  %s2659_s10 = smov (!%p2038_p3, %s1293_s10), 1  ;;  %v1793_v61 = vld [vmem:[%s2650_s3 + $0xc4] sm:$0xf0]  ;;  %v1400_v0 = vor.u32 %v1777_v58, %v1399_v57  ;;  %v1312_v1 = vor.u32 %v1755_v53, %v1311_v52 }
  0x1a   : > { %436 = vmatpush.bf16.msra.mxu0 %v1336_v22  ;;  %v1303_v62 = vld [vmem:[%s2648_s1] sm:$0xf]  ;;  %v1753_v63 = vld [vmem:[%s2648_s1 + $0x4] sm:$0xf0]  ;;  %v1752_v2 = vld [vmem:[%s2648_s1 + $0x4] sm:$0xf]  ;;  %v1464_v3 = vor.u32 %v1793_v61, %v1463_v59  ;;  %v1316_v6 = vor.u32 %v1754_v54, %v1313_v60 }
  0x1b   : > { %449 = vmatpush.bf16.msra.mxu1 %v1340_v26  ;;  %663 = vmatpush.bf16.msra.mxu2 %v1408_v48  ;;  %v1391_v4 = vld [vmem:[%s2650_s3 + $0x30] sm:$0xf]  ;;  %v1775_v5 = vld [vmem:[%s2650_s3 + $0x34] sm:$0xf0]  ;;  %v1305_v7 = vld [vmem:[%s2648_s1 + $0x8] sm:$0xf0]  ;;  %v1304_v15 = vor.u32 %v1753_v63, %v1303_v62 }
  0x1c   : > { %v1455_v8 = vld [vmem:[%s2650_s3 + $0xb0] sm:$0xf]  ;;  %v1791_v9 = vld [vmem:[%s2650_s3 + $0xb4] sm:$0xf0]  ;;  %s1298_s22 = sshll.u32 %s2659_s10, 2  ;;  %v1392_v14 = vor.u32 %v1775_v5, %v1391_v4  ;;  %v1308_v19 = vor.u32 %v1752_v2, %v1305_v7  ;;  %s1751_s16 = sshll.u32 %s2659_s10, 4 }
  0x1d   : > { %676 = vmatpush.bf16.msra.mxu3 %v1472_v55  ;;  %v1782_v10 = vld [vmem:[%s2650_s3 + $0x74] sm:$0xf]  ;;  %v1425_v11 = vld [vmem:[%s2650_s3 + $0x78] sm:$0xf0]  ;;  %v1456_v16 = vor.u32 %v1791_v9, %v1455_v8  ;;  %v1383_v17 = vld [vmem:[%s2650_s3 + $0x20] sm:$0xf]  ;;  %s324_s17 = scalar_lea.vmem %s2647_s0, %s1298_s22  ;;  %s329_s20 = scalar_lea.vmem %s2656_s9, %s1751_s16 }
  0x1e   : > { %437 = vmatpush.bf16.msra.mxu0 %v1328_v36  ;;  %v1798_v12 = vld [vmem:[%s2650_s3 + $0xf4] sm:$0xf]  ;;  %v1489_v13 = vld [vmem:[%s2650_s3 + $0xf8] sm:$0xf0]  ;;  %v1773_v18 = vld [vmem:[%s2650_s3 + $0x24] sm:$0xf0]  ;;  %v1428_v20 = vor.u32 %v1782_v10, %v1425_v11 }
  0x1f   : > { %450 = vmatpush.bf16.msra.mxu1 %v1332_v41  ;;  %664 = vmatpush.bf16.msra.mxu2 %v1400_v0  ;;  %v1447_v21 = vld [vmem:[%s2650_s3 + $0xa0] sm:$0xf]  ;;  %v1789_v22 = vld [vmem:[%s2650_s3 + $0xa4] sm:$0xf0]  ;;  %v1492_v23 = vor.u32 %v1798_v12, %v1489_v13  ;;  %v1780_v24 = vld [vmem:[%s2650_s3 + $0x64] sm:$0xf]  ;;  %v1384_v28 = vor.u32 %v1773_v18, %v1383_v17 }
  0x20   : > { %v1417_v25 = vld [vmem:[%s2650_s3 + $0x68] sm:$0xf0]  ;;  %v1796_v26 = vld [vmem:[%s2650_s3 + $0xe4] sm:$0xf]  ;;  %v330_v29 = vld [vmem:[%s324_s17] sm:$0xf]  ;;  %v1448_v30 = vor.u32 %v1789_v22, %v1447_v21 }
  0x21   : > { %677 = vmatpush.bf16.msra.mxu3 %v1464_v3  ;;  %v1481_v27 = vld [vmem:[%s2650_s3 + $0xe8] sm:$0xf0]  ;;  %v1420_v31 = vor.u32 %v1780_v24, %v1417_v25  ;;  %v1778_v33 = vld [vmem:[%s2650_s3 + $0x54] sm:$0xf]  ;;  %v1409_v34 = vld [vmem:[%s2650_s3 + $0x58] sm:$0xf0] }
  0x22   : > { %438 = vmatpush.bf16.msra.mxu0 %v1320_v51  ;;  %v1484_v32 = vor.u32 %v1796_v26, %v1481_v27  ;;  %v1794_v35 = vld [vmem:[%s2650_s3 + $0xd4] sm:$0xf]  ;;  %v1473_v36 = vld [vmem:[%s2650_s3 + $0xd8] sm:$0xf0]  ;;  %v1412_v37 = vor.u32 %v1778_v33, %v1409_v34  ;;  %v1776_v39 = vld [vmem:[%s2650_s3 + $0x44] sm:$0xf] }
  0x23   : > { %451 = vmatpush.bf16.msra.mxu1 %v1324_v56  ;;  %665 = vmatpush.bf16.msra.mxu2 %v1392_v14  ;;  %v1476_v38 = vor.u32 %v1794_v35, %v1473_v36  ;;  %v1401_v40 = vld [vmem:[%s2650_s3 + $0x48] sm:$0xf0]  ;;  %v1792_v41 = vld [vmem:[%s2650_s3 + $0xc4] sm:$0xf]  ;;  %v1774_v45 = vld [vmem:[%s2650_s3 + $0x34] sm:$0xf] }
  0x24   : > { %v1465_v42 = vld [vmem:[%s2650_s3 + $0xc8] sm:$0xf0]  ;;  %v1404_v43 = vor.u32 %v1776_v39, %v1401_v40  ;;  %v1393_v46 = vld [vmem:[%s2650_s3 + $0x38] sm:$0xf0]  ;;  %v1790_v47 = vld [vmem:[%s2650_s3 + $0xb4] sm:$0xf] }
  0x25   : > { %678 = vmatpush.bf16.msra.mxu3 %v1456_v16  ;;  %v1468_v44 = vor.u32 %v1792_v41, %v1465_v42  ;;  %v1457_v48 = vld [vmem:[%s2650_s3 + $0xb8] sm:$0xf0]  ;;  %v1396_v49 = vor.u32 %v1774_v45, %v1393_v46  ;;  %v1772_v51 = vld [vmem:[%s2650_s3 + $0x24] sm:$0xf]  ;;  %v1385_v52 = vld [vmem:[%s2650_s3 + $0x28] sm:$0xf0] }
  0x26   : > { %439 = vmatpush.bf16.msra.mxu0 %v1312_v1  ;;  %v1460_v50 = vor.u32 %v1790_v47, %v1457_v48  ;;  %v1788_v53 = vld [vmem:[%s2650_s3 + $0xa4] sm:$0xf]  ;;  %v1449_v54 = vld [vmem:[%s2650_s3 + $0xa8] sm:$0xf0]  ;;  %v1388_v55 = vor.u32 %v1772_v51, %v1385_v52  ;;  %v1375_v57 = vld [vmem:[%s2650_s3 + $0x10] sm:$0xf] }
  0x27   : > { %452 = vmatpush.bf16.msra.mxu1 %v1316_v6  ;;  %666 = vmatpush.bf16.msra.mxu2 %v1384_v28  ;;  %v1452_v56 = vor.u32 %v1788_v53, %v1449_v54  ;;  %v1771_v58 = vld [vmem:[%s2650_s3 + $0x14] sm:$0xf0]  ;;  %v1439_v59 = vld [vmem:[%s2650_s3 + $0x90] sm:$0xf]  ;;  %v1770_v62 = vld [vmem:[%s2650_s3 + $0x14] sm:$0xf] }
  0x28   : > { %v1376_v60 = vor.u32 %v1771_v58, %v1375_v57  ;;  %v1787_v61 = vld [vmem:[%s2650_s3 + $0x94] sm:$0xf0]  ;;  %v1377_v63 = vld [vmem:[%s2650_s3 + $0x18] sm:$0xf0]  ;;  %v1786_v2 = vld [vmem:[%s2650_s3 + $0x94] sm:$0xf] }
  0x29   : > { %679 = vmatpush.bf16.msra.mxu3 %v1448_v30  ;;  %v1440_v0 = vor.u32 %v1787_v61, %v1439_v59  ;;  %v1380_v1 = vor.u32 %v1770_v62, %v1377_v63  ;;  %v1441_v3 = vld [vmem:[%s2650_s3 + $0x98] sm:$0xf0]  ;;  %v1367_v5 = vld [vmem:[%s2650_s3] sm:$0xf]  ;;  %v1769_v6 = vld [vmem:[%s2650_s3 + $0x4] sm:$0xf0] }
  0x2a   : > { %440 = vmatpush.bf16.msra.mxu0 %v1304_v15  ;;  %v1444_v4 = vor.u32 %v1786_v2, %v1441_v3  ;;  %v1431_v7 = vld [vmem:[%s2650_s3 + $0x80] sm:$0xf]  ;;  %v1368_v8 = vor.u32 %v1769_v6, %v1367_v5  ;;  %v1785_v9 = vld [vmem:[%s2650_s3 + $0x84] sm:$0xf0]  ;;  %v1768_v10 = vld [vmem:[%s2650_s3 + $0x4] sm:$0xf] }
  0x2b   : > { %453 = vmatpush.bf16.msra.mxu1 %v1308_v19  ;;  %667 = vmatpush.bf16.msra.mxu2 %v1376_v60  ;;  %v1369_v11 = vld [vmem:[%s2650_s3 + $0x8] sm:$0xf0]  ;;  %v1432_v12 = vor.u32 %v1785_v9, %v1431_v7  ;;  %v1784_v14 = vld [vmem:[%s2650_s3 + $0x84] sm:$0xf]  ;;  %v1615_v17 = vld [vmem:[%s2652_s5 + $0xf0] sm:$0xf] }
  0x2c   : > { %v1372_v13 = vor.u32 %v1768_v10, %v1369_v11  ;;  %v1433_v15 = vld [vmem:[%s2650_s3 + $0x88] sm:$0xf0]  ;;  %v1831_v18 = vld [vmem:[%s2652_s5 + $0xf4] sm:$0xf0]  ;;  %v1830_v19 = vld [vmem:[%s2652_s5 + $0xf4] sm:$0xf] }
  0x2d   : > { %441 = vmatmul.bf16.vlgmr.msra.gmra.mxu0 %v330_v29  ;;  %680 = vmatpush.bf16.msra.mxu3 %v1440_v0  ;;  %v1436_v16 = vor.u32 %v1784_v14, %v1433_v15  ;;  %v1617_v21 = vld [vmem:[%s2652_s5 + $0xf8] sm:$0xf0]  ;;  %v1607_v22 = vld [vmem:[%s2652_s5 + $0xe0] sm:$0xf]  ;;  %v1828_v25 = vld [vmem:[%s2652_s5 + $0xe4] sm:$0xf] }
  0x2e   : > { %687 = vmatpush.bf16.msrb.mxu0 %v1428_v20  ;;  %454 = vmatmul.bf16.vlgmr.msra.gmra.mxu1 %v330_v29  ;;  %v1616_v20 = vor.u32 %v1831_v18, %v1615_v17  ;;  %v1620_v24 = vor.u32 %v1830_v19, %v1617_v21  ;;  %v1609_v26 = vld [vmem:[%s2652_s5 + $0xe8] sm:$0xf0]  ;;  %v1551_v27 = vld [vmem:[%s2652_s5 + $0x70] sm:$0xf]  ;;  %v1815_v29 = vld [vmem:[%s2652_s5 + $0x74] sm:$0xf0] }
  0x2f   : > { %700 = vmatpush.bf16.msrb.mxu1 %v1492_v23  ;;  %668 = vmatpush.bf16.msra.mxu2 %v1368_v8  ;;  %v1829_v23 = vld [vmem:[%s2652_s5 + $0xe4] sm:$0xf0]  ;;  %v1814_v30 = vld [vmem:[%s2652_s5 + $0x74] sm:$0xf]  ;;  %v1552_v33 = vor.u32 %v1815_v29, %v1551_v27  ;;  %v1599_v35 = vld [vmem:[%s2652_s5 + $0xd0] sm:$0xf] }
  0x30   : > { %v1608_v28 = vor.u32 %v1829_v23, %v1607_v22  ;;  %v1827_v36 = vld [vmem:[%s2652_s5 + $0xd4] sm:$0xf0]  ;;  %v1543_v39 = vld [vmem:[%s2652_s5 + $0x60] sm:$0xf]  ;;  %v1813_v40 = vld [vmem:[%s2652_s5 + $0x64] sm:$0xf0] }
  0x31   : > { %681 = vmatpush.bf16.msra.mxu3 %v1432_v12  ;;  %v1544_v41 = vor.u32 %v1813_v40, %v1543_v39  ;;  %v1812_v42 = vld [vmem:[%s2652_s5 + $0x64] sm:$0xf]  ;;  %v1591_v46 = vld [vmem:[%s2652_s5 + $0xc0] sm:$0xf]  ;;  %v1825_v47 = vld [vmem:[%s2652_s5 + $0xc4] sm:$0xf0] }
  0x32   : > { %688 = vmatpush.bf16.msrb.mxu0 %v1420_v31  ;;  %v1553_v31 = vld [vmem:[%s2652_s5 + $0x78] sm:$0xf0]  ;;  %v1810_v51 = vld [vmem:[%s2652_s5 + $0x54] sm:$0xf]  ;;  %v1824_v52 = vld [vmem:[%s2652_s5 + $0xc4] sm:$0xf]  ;;  %v1592_v58 = vor.u32 %v1825_v47, %v1591_v46 }
  0x33   : > { %701 = vmatpush.bf16.msrb.mxu1 %v1484_v32  ;;  %v1612_v32 = vor.u32 %v1828_v25, %v1609_v26  ;;  %v1556_v34 = vor.u32 %v1814_v30, %v1553_v31  ;;  %915 = vmatpush.bf16.msrb.mxu2 %v1552_v33  ;;  %v1593_v53 = vld [vmem:[%s2652_s5 + $0xc8] sm:$0xf0]  ;;  %v1537_v54 = vld [vmem:[%s2652_s5 + $0x58] sm:$0xf0]  ;;  %v1527_v57 = vld [vmem:[%s2652_s5 + $0x40] sm:$0xf] }
  0x34   : > { %v1809_v59 = vld [vmem:[%s2652_s5 + $0x44] sm:$0xf0]  ;;  %v1808_v60 = vld [vmem:[%s2652_s5 + $0x44] sm:$0xf]  ;;  %v1529_v61 = vld [vmem:[%s2652_s5 + $0x48] sm:$0xf0]  ;;  %v1596_v62 = vor.u32 %v1824_v52, %v1593_v53 }
  0x35   : > { %928 = vmatpush.bf16.msrb.mxu3 %v1616_v20  ;;  %v1583_v63 = vld [vmem:[%s2652_s5 + $0xb0] sm:$0xf]  ;;  %v1823_v0 = vld [vmem:[%s2652_s5 + $0xb4] sm:$0xf0]  ;;  %v1585_v2 = vld [vmem:[%s2652_s5 + $0xb8] sm:$0xf0]  ;;  %v1528_v3 = vor.u32 %v1809_v59, %v1527_v57 }
  0x36   : > { %689 = vmatpush.bf16.msrb.mxu0 %v1412_v37  ;;  %v1826_v37 = vld [vmem:[%s2652_s5 + $0xd4] sm:$0xf]  ;;  %v1584_v5 = vor.u32 %v1823_v0, %v1583_v63  ;;  %v1575_v7 = vld [vmem:[%s2652_s5 + $0xa0] sm:$0xf]  ;;  %v1821_v8 = vld [vmem:[%s2652_s5 + $0xa4] sm:$0xf0] }
  0x37   : > { %702 = vmatpush.bf16.msrb.mxu1 %v1476_v38  ;;  %v1601_v38 = vld [vmem:[%s2652_s5 + $0xd8] sm:$0xf0]  ;;  %916 = vmatpush.bf16.msrb.mxu2 %v1544_v41  ;;  %v347_v9 = vld [vmem:[%s2649_s2] sm:$0x3]  ;;  %v1820_v10 = vld [vmem:[%s2652_s5 + $0xa4] sm:$0xf]  ;;  %v1576_v12 = vor.u32 %v1821_v8, %v1575_v7 }
  0x38   : > { %v1604_v48 = vor.u32 %v1826_v37, %v1601_v38  ;;  %v1577_v11 = vld [vmem:[%s2652_s5 + $0xa8] sm:$0xf0]  ;;  %v350_v15 = vperm.slane %v347_v9, 1  ;;  %v1519_v26 = vld [vmem:[%s2652_s5 + $0x30] sm:$0xf] }
  0x39   : > { %929 = vmatpush.bf16.msrb.mxu3 %v1608_v28  ;;  %v1580_v14 = vor.u32 %v1820_v10, %v1577_v11  ;;  %v1807_v27 = vld [vmem:[%s2652_s5 + $0x34] sm:$0xf0]  ;;  %v1806_v28 = vld [vmem:[%s2652_s5 + $0x34] sm:$0xf]  ;;  %v1521_v30 = vld [vmem:[%s2652_s5 + $0x38] sm:$0xf0] }
  0x3a   : > { %690 = vmatpush.bf16.msrb.mxu0 %v1404_v43  ;;  %v1545_v43 = vld [vmem:[%s2652_s5 + $0x68] sm:$0xf0]  ;;  %v1520_v29 = vor.u32 %v1807_v27, %v1519_v26  ;;  %v1524_v31 = vor.u32 %v1806_v28, %v1521_v30  ;;  %v1819_v33 = vld [vmem:[%s2652_s5 + $0x94] sm:$0xf0]  ;;  %v1511_v38 = vld [vmem:[%s2652_s5 + $0x20] sm:$0xf] }
  0x3b   : > { %703 = vmatpush.bf16.msrb.mxu1 %v1468_v44  ;;  %v1600_v44 = vor.u32 %v1827_v36, %v1599_v35  ;;  %v1548_v45 = vor.u32 %v1812_v42, %v1545_v43  ;;  %v1569_v36 = vld [vmem:[%s2652_s5 + $0x98] sm:$0xf0]  ;;  %v1805_v39 = vld [vmem:[%s2652_s5 + $0x24] sm:$0xf0]  ;;  %v1804_v40 = vld [vmem:[%s2652_s5 + $0x24] sm:$0xf] }
  0x3c   : > { %v1512_v41 = vor.u32 %v1805_v39, %v1511_v38  ;;  %v1513_v42 = vld [vmem:[%s2652_s5 + $0x28] sm:$0xf0]  ;;  %v1816_v46 = vld [vmem:[%s2652_s5 + $0x84] sm:$0xf]  ;;  %v1802_v53 = vld [vmem:[%s2652_s5 + $0x14] sm:$0xf] }
  0x3d   : > { %930 = vmatpush.bf16.msrb.mxu3 %v1600_v44  ;;  %v1516_v43 = vor.u32 %v1804_v40, %v1513_v42  ;;  %v1559_v44 = vld [vmem:[%s2652_s5 + $0x80] sm:$0xf]  ;;  %v1801_v57 = vld [vmem:[%s2652_s5 + $0x4] sm:$0xf0]  ;;  %v1863_v63 = vld [vmem:[%s2654_s7 + $0xf4] sm:$0xf0] }
  0x3e   : > { %691 = vmatpush.bf16.msrb.mxu0 %v1396_v49  ;;  %v1535_v49 = vld [vmem:[%s2652_s5 + $0x50] sm:$0xf]  ;;  %v1862_v0 = vld [vmem:[%s2654_s7 + $0xf4] sm:$0xf]  ;;  %v1737_v7 = vld [vmem:[%s2654_s7 + $0xe8] sm:$0xf0] }
  0x3f   : > { %704 = vmatpush.bf16.msrb.mxu1 %v1460_v50  ;;  %v1811_v50 = vld [vmem:[%s2652_s5 + $0x54] sm:$0xf0]  ;;  %v1679_v8 = vld [vmem:[%s2654_s7 + $0x70] sm:$0xf]  ;;  %v1846_v11 = vld [vmem:[%s2654_s7 + $0x74] sm:$0xf] }
  0x40   : > { %v1847_v10 = vld [vmem:[%s2654_s7 + $0x74] sm:$0xf0]  ;;  %v1719_v27 = vld [vmem:[%s2654_s7 + $0xc0] sm:$0xf]  ;;  %v1857_v28 = vld [vmem:[%s2654_s7 + $0xc4] sm:$0xf0] }
  0x41   : > { %931 = vmatpush.bf16.msrb.mxu3 %v1592_v58  ;;  %v1800_v58 = vld [vmem:[%s2652_s5 + $0x4] sm:$0xf]  ;;  %v1663_v30 = vld [vmem:[%s2654_s7 + $0x50] sm:$0xf]  ;;  %v495_v38 = vld [vmem:[%s2651_s4] sm:$0x3]  ;;  %v1720_v39 = vor.u32 %v1857_v28, %v1719_v27 }
  0x42   : > { %692 = vmatpush.bf16.msrb.mxu0 %v1388_v55  ;;  %v1536_v55 = vor.u32 %v1811_v50, %v1535_v49  ;;  %v1503_v50 = vld [vmem:[%s2652_s5 + $0x10] sm:$0xf]  ;;  %v1836_v27 = vld [vmem:[%s2654_s7 + $0x24] sm:$0xf] }
  0x43   : > { %705 = vmatpush.bf16.msrb.mxu1 %v1452_v56  ;;  %v1540_v56 = vor.u32 %v1810_v51, %v1537_v54  ;;  %v1803_v51 = vld [vmem:[%s2652_s5 + $0x14] sm:$0xf0]  ;;  %v1505_v54 = vld [vmem:[%s2652_s5 + $0x18] sm:$0xf0] }
  0x44   : > { %917 = vmatpush.bf16.msrb.mxu2 %v1536_v55  ;;  %v1504_v52 = vor.u32 %v1803_v51, %v1503_v50  ;;  %v1508_v55 = vor.u32 %v1802_v53, %v1505_v54 }
  0x45   : > { %932 = vmatpush.bf16.msrb.mxu3 %v1584_v5 }
  0x46   : > { %693 = vmatpush.bf16.msrb.mxu0 %v1380_v1  ;;  %v1822_v1 = vld [vmem:[%s2652_s5 + $0xb4] sm:$0xf] }
  0x47   : > { %706 = vmatpush.bf16.msrb.mxu1 %v1444_v4  ;;  %v1532_v4 = vor.u32 %v1808_v60, %v1529_v61  ;;  %v1588_v6 = vor.u32 %v1822_v1, %v1585_v2  ;;  %v1497_v60 = vld [vmem:[%s2652_s5 + $0x8] sm:$0xf0]  ;;  %v1745_v2 = vld [vmem:[%s2654_s7 + $0xf8] sm:$0xf0] }
  0x48   : > { %918 = vmatpush.bf16.msrb.mxu2 %v1528_v3  ;;  %v1500_v61 = vor.u32 %v1800_v58, %v1497_v60  ;;  %v1735_v3 = vld [vmem:[%s2654_s7 + $0xe0] sm:$0xf]  ;;  %v1748_v5 = vor.u32 %v1862_v0, %v1745_v2  ;;  %v1855_v60 = vld [vmem:[%s2654_s7 + $0xb4] sm:$0xf0]  ;;  %v1841_v2 = vld [vmem:[%s2654_s7 + $0x44] sm:$0xf0] }
  0x49   : > { %933 = vmatpush.bf16.msrb.mxu3 %v1576_v12  ;;  %v1681_v12 = vld [vmem:[%s2654_s7 + $0x78] sm:$0xf0] }
  0x4a   : > { %694 = vmatpush.bf16.msrb.mxu0 %v1372_v13  ;;  %v349_v13 = vperm.slane %v347_v9, 0 }
  0x4b   : > { %707 = vmatpush.bf16.msrb.mxu1 %v1436_v16 }
  0x4c   : > { %919 = vmatpush.bf16.msrb.mxu2 %v1520_v29 }
  0x4e   : > { %941 = vmatpush.bf16.msra.mxu0 %v1556_v34  ;;  %v1818_v34 = vld [vmem:[%s2652_s5 + $0x94] sm:$0xf] }
  0x4f   : > { %954 = vmatpush.bf16.msra.mxu1 %v1620_v24  ;;  %v1572_v37 = vor.u32 %v1818_v34, %v1569_v36  ;;  %v1721_v34 = vld [vmem:[%s2654_s7 + $0xc8] sm:$0xf0] }
  0x50   : > { %920 = vmatpush.bf16.msrb.mxu2 %v1512_v41  ;;  %v498_v41 = vperm.slane %v495_v38, 1 }
  0x52   : > { %942 = vmatpush.bf16.msra.mxu0 %v1548_v45  ;;  %v1817_v45 = vld [vmem:[%s2652_s5 + $0x84] sm:$0xf0] }
  0x53   : > { %955 = vmatpush.bf16.msra.mxu1 %v1612_v32  ;;  %v1567_v32 = vld [vmem:[%s2652_s5 + $0x90] sm:$0xf]  ;;  %v1560_v47 = vor.u32 %v1817_v45, %v1559_v44 }
  0x54   : > { %v1568_v35 = vor.u32 %v1819_v33, %v1567_v32  ;;  %921 = vmatpush.bf16.msrb.mxu2 %v1504_v52  ;;  %v1842_v32 = vld [vmem:[%s2654_s7 + $0x54] sm:$0xf]  ;;  %v1856_v33 = vld [vmem:[%s2654_s7 + $0xc4] sm:$0xf] }
  0x55   : > { %v1724_v40 = vor.u32 %v1856_v33, %v1721_v34  ;;  %v1848_v33 = vld [vmem:[%s2654_s7 + $0x84] sm:$0xf] }
  0x56   : > { %943 = vmatpush.bf16.msra.mxu0 %v1540_v56  ;;  %934 = vmatpush.bf16.msrb.mxu3 %v1568_v35  ;;  %v1495_v56 = vld [vmem:[%s2652_s5] sm:$0xf]  ;;  %v1665_v35 = vld [vmem:[%s2654_s7 + $0x58] sm:$0xf0] }
  0x57   : > { %956 = vmatpush.bf16.msra.mxu1 %v1604_v48  ;;  %v1561_v48 = vld [vmem:[%s2652_s5 + $0x88] sm:$0xf0]  ;;  %v1496_v59 = vor.u32 %v1801_v57, %v1495_v56 }
  0x58   : > { %v1564_v49 = vor.u32 %v1816_v46, %v1561_v48  ;;  %v497_v46 = vperm.slane %v495_v38, 0  ;;  %v1835_v38 = vld [vmem:[%s2654_s7 + $0x14] sm:$0xf0] }
  0x59   : > { %922 = vmatpush.bf16.msrb.mxu2 %v1496_v59  ;;  %v1711_v59 = vld [vmem:[%s2654_s7 + $0xb0] sm:$0xf] }
  0x5a   : > { %944 = vmatpush.bf16.msra.mxu0 %v1532_v4  ;;  %935 = vmatpush.bf16.msrb.mxu3 %v1560_v47  ;;  %v1861_v4 = vld [vmem:[%s2654_s7 + $0xe4] sm:$0xf0] }
  0x5b   : > { %957 = vmatpush.bf16.msra.mxu1 %v1596_v62  ;;  %v1743_v62 = vld [vmem:[%s2654_s7 + $0xf0] sm:$0xf]  ;;  %v1736_v9 = vor.u32 %v1861_v4, %v1735_v3  ;;  %v1840_v3 = vld [vmem:[%s2654_s7 + $0x44] sm:$0xf] }
  0x5c   : > { %v1744_v1 = vor.u32 %v1863_v63, %v1743_v62  ;;  %v1712_v62 = vor.u32 %v1855_v60, %v1711_v59  ;;  %v1713_v63 = vld [vmem:[%s2654_s7 + $0xb8] sm:$0xf0] }
  0x5e   : > { %945 = vmatpush.bf16.msra.mxu0 %v1524_v31  ;;  %v1843_v31 = vld [vmem:[%s2654_s7 + $0x54] sm:$0xf0] }
  0x5f   : > { %958 = vmatpush.bf16.msra.mxu1 %v1588_v6  ;;  %v1860_v6 = vld [vmem:[%s2654_s7 + $0xe4] sm:$0xf]  ;;  %v1664_v36 = vor.u32 %v1843_v31, %v1663_v30  ;;  %v1687_v31 = vld [vmem:[%s2654_s7 + $0x80] sm:$0xf] }
  0x62   : > { %946 = vmatpush.bf16.msra.mxu0 %v1516_v43 }
  0x63   : > { %959 = vmatpush.bf16.msra.mxu1 %v1580_v14  ;;  %v1680_v14 = vor.u32 %v1847_v10, %v1679_v8  ;;  %v1852_v10 = vld [vmem:[%s2654_s7 + $0xa4] sm:$0xf] }
  0x66   : > { %947 = vmatpush.bf16.msra.mxu0 %v1508_v55 }
  0x67   : > { %960 = vmatpush.bf16.msra.mxu1 %v1572_v37  ;;  %v1668_v37 = vor.u32 %v1842_v32, %v1665_v35  ;;  %v1849_v32 = vld [vmem:[%s2654_s7 + $0x84] sm:$0xf0]  ;;  %v1689_v35 = vld [vmem:[%s2654_s7 + $0x88] sm:$0xf0] }
  0x68   : > { %v1688_v34 = vor.u32 %v1849_v32, %v1687_v31 }
  0x6a   : > { %948 = vmatpush.bf16.msra.mxu0 %v1500_v61  ;;  %v1854_v61 = vld [vmem:[%s2654_s7 + $0xb4] sm:$0xf] }
  0x6b   : > { %961 = vmatpush.bf16.msra.mxu1 %v1564_v49  ;;  %v1716_v0 = vor.u32 %v1854_v61, %v1713_v63 }
  0xaa   : > { %v442_v16 = vpop.f32.mrf.mxu0 }
  0xab   : > { %v443_v17 = vadd.f32 %v442_v16, %v349_v13  ;;  %v455_v18 = vpop.f32.mrf.mxu1  ;;  %v1740_v13 = vor.u32 %v1860_v6, %v1737_v7  ;;  %v1727_v16 = vld [vmem:[%s2654_s7 + $0xd0] sm:$0xf]  ;;  %v1703_v6 = vld [vmem:[%s2654_s7 + $0xa0] sm:$0xf]  ;;  %v1853_v7 = vld [vmem:[%s2654_s7 + $0xa4] sm:$0xf0] }
  0xac   : > { %v456_v19 = vadd.f32 %v455_v18, %v350_v15  ;;  %v1684_v15 = vor.u32 %v1846_v11, %v1681_v12  ;;  %v1858_v18 = vld [vmem:[%s2654_s7 + $0xd4] sm:$0xf]  ;;  %v1705_v11 = vld [vmem:[%s2654_s7 + $0xa8] sm:$0xf0] }
  0xad   : > { %v459_v20 = vmax.f32 %v443_v17, 0.0  ;;  %v1859_v17 = vld [vmem:[%s2654_s7 + $0xd4] sm:$0xf0]  ;;  %v1708_v12 = vor.u32 %v1852_v10, %v1705_v11 }
  0xae   : > { %v460_v21 = vmax.f32 %v456_v19, 0.0  ;;  %v1729_v19 = vld [vmem:[%s2654_s7 + $0xd8] sm:$0xf0] }
  0xaf   : > { %v461_v22 = vpack.c.bf16 %v459_v20, %v459_v20  ;;  %v1671_v20 = vld [vmem:[%s2654_s7 + $0x60] sm:$0xf]  ;;  %v1732_v29 = vor.u32 %v1858_v18, %v1729_v19  ;;  %v1695_v19 = vld [vmem:[%s2654_s7 + $0x90] sm:$0xf] }
  0xb0   : > { %v462_v23 = vpack.c.bf16 %v460_v21, %v460_v21  ;;  %v1845_v21 = vld [vmem:[%s2654_s7 + $0x64] sm:$0xf0] }
  0xb1   : > { %669 = vmatmul.bf16.vlgmr.msra.gmra.mxu2 %v461_v22  ;;  %695 = vmatmul.bf16.vlgmr.msrb.gmra.mxu0 %v461_v22  ;;  %v1672_v22 = vor.u32 %v1845_v21, %v1671_v20  ;;  %v1851_v20 = vld [vmem:[%s2654_s7 + $0x94] sm:$0xf0] }
  0xb2   : > { %682 = vmatmul.bf16.vlgmr.msra.gmra.mxu3 %v462_v23  ;;  %708 = vmatmul.bf16.vlgmr.msrb.gmra.mxu1 %v462_v23  ;;  %v444_v24 = vpop.f32.mrf.mxu0  ;;  %v1844_v23 = vld [vmem:[%s2654_s7 + $0x64] sm:$0xf]  ;;  %v1696_v21 = vor.u32 %v1851_v20, %v1695_v19 }
  0xb3   : > { %v457_v25 = vpop.f32.mrf.mxu1  ;;  %1182 = vmatpush.bf16.msra.mxu3 %v1744_v1  ;;  %1208 = vmatpush.bf16.msrb.mxu1 %v1748_v5  ;;  %v1673_v24 = vld [vmem:[%s2654_s7 + $0x68] sm:$0xf0]  ;;  %v1655_v1 = vld [vmem:[%s2654_s7 + $0x40] sm:$0xf] }
  0xb4   : > { %1169 = vmatpush.bf16.msra.mxu2 %v1680_v14  ;;  %1195 = vmatpush.bf16.msrb.mxu0 %v1684_v15  ;;  %v1728_v25 = vor.u32 %v1859_v17, %v1727_v16  ;;  %v1676_v26 = vor.u32 %v1844_v23, %v1673_v24  ;;  %v1656_v4 = vor.u32 %v1841_v2, %v1655_v1  ;;  %v1657_v5 = vld [vmem:[%s2654_s7 + $0x48] sm:$0xf0]  ;;  %v1839_v14 = vld [vmem:[%s2654_s7 + $0x34] sm:$0xf0]  ;;  %v1838_v15 = vld [vmem:[%s2654_s7 + $0x34] sm:$0xf] }
  0xb5   : > { %v1660_v8 = vor.u32 %v1840_v3, %v1657_v5  ;;  %v1649_v17 = vld [vmem:[%s2654_s7 + $0x38] sm:$0xf0]  ;;  %v1003_v5 = vld [vmem:[%s2655_s8] sm:$0x3] }
  0xb6   : > { %v1652_v18 = vor.u32 %v1838_v15, %v1649_v17  ;;  %v1697_v23 = vld [vmem:[%s2654_s7 + $0x98] sm:$0xf0] }
  0xb7   : > { %1183 = vmatpush.bf16.msra.mxu3 %v1736_v9  ;;  %1209 = vmatpush.bf16.msrb.mxu1 %v1740_v13  ;;  %v1704_v9 = vor.u32 %v1853_v7, %v1703_v6  ;;  %v1647_v13 = vld [vmem:[%s2654_s7 + $0x30] sm:$0xf]  ;;  %v1006_v6 = vperm.slane %v1003_v5, 1 }
  0xb8   : > { %1170 = vmatpush.bf16.msra.mxu2 %v1672_v22  ;;  %1196 = vmatpush.bf16.msrb.mxu0 %v1676_v26  ;;  %v1648_v16 = vor.u32 %v1839_v14, %v1647_v13  ;;  %v1850_v22 = vld [vmem:[%s2654_s7 + $0x94] sm:$0xf]  ;;  %v1837_v26 = vld [vmem:[%s2654_s7 + $0x24] sm:$0xf0] }
  0xb9   : > { %v1700_v24 = vor.u32 %v1850_v22, %v1697_v23 }
  0xbb   : > { %1184 = vmatpush.bf16.msra.mxu3 %v1728_v25  ;;  %1210 = vmatpush.bf16.msrb.mxu1 %v1732_v29  ;;  %v1639_v25 = vld [vmem:[%s2654_s7 + $0x20] sm:$0xf]  ;;  %v1641_v29 = vld [vmem:[%s2654_s7 + $0x28] sm:$0xf0] }
  0xbc   : > { %1171 = vmatpush.bf16.msra.mxu2 %v1664_v36  ;;  %1197 = vmatpush.bf16.msrb.mxu0 %v1668_v37  ;;  %v1640_v28 = vor.u32 %v1837_v26, %v1639_v25  ;;  %v1644_v30 = vor.u32 %v1836_v27, %v1641_v29  ;;  %v1692_v36 = vor.u32 %v1848_v33, %v1689_v35  ;;  %v1631_v37 = vld [vmem:[%s2654_s7 + $0x10] sm:$0xf] }
  0xbf   : > { %1185 = vmatpush.bf16.msra.mxu3 %v1720_v39  ;;  %1211 = vmatpush.bf16.msrb.mxu1 %v1724_v40  ;;  %v1632_v39 = vor.u32 %v1835_v38, %v1631_v37  ;;  %v1834_v40 = vld [vmem:[%s2654_s7 + $0x14] sm:$0xf] }
  0xc0   : > { %1172 = vmatpush.bf16.msra.mxu2 %v1656_v4  ;;  %1198 = vmatpush.bf16.msrb.mxu0 %v1660_v8 }
  0xc3   : > { %1186 = vmatpush.bf16.msra.mxu3 %v1712_v62  ;;  %1212 = vmatpush.bf16.msrb.mxu1 %v1716_v0 }
  0xc4   : > { %1173 = vmatpush.bf16.msra.mxu2 %v1648_v16  ;;  %1199 = vmatpush.bf16.msrb.mxu0 %v1652_v18 }
  0xc7   : > { %1187 = vmatpush.bf16.msra.mxu3 %v1704_v9  ;;  %1213 = vmatpush.bf16.msrb.mxu1 %v1708_v12  ;;  %v1005_v12 = vperm.slane %v1003_v5, 0 }
  0xc8   : > { %1174 = vmatpush.bf16.msra.mxu2 %v1640_v28  ;;  %1200 = vmatpush.bf16.msrb.mxu0 %v1644_v30 }
  0xcb   : > { %1188 = vmatpush.bf16.msra.mxu3 %v1696_v21  ;;  %1214 = vmatpush.bf16.msrb.mxu1 %v1700_v24 }
  0xcc   : > { %1175 = vmatpush.bf16.msra.mxu2 %v1632_v39 }
  0xcf   : > { %1189 = vmatpush.bf16.msra.mxu3 %v1688_v34  ;;  %1215 = vmatpush.bf16.msrb.mxu1 %v1692_v36 }
 0x12e   : > { %v696_v42 = vpop.f32.mrf.mxu0 }
 0x12f   : > { %v697_v43 = vadd.f32 %v696_v42, %v498_v41  ;;  %v709_v44 = vpop.f32.mrf.mxu1  ;;  %v1633_v41 = vld [vmem:[%s2654_s7 + $0x18] sm:$0xf0] }
 0x130   : > { %v1636_v42 = vor.u32 %v1834_v40, %v1633_v41 }
 0x131   : > { %v710_v45 = vadd.f32 %v709_v44, %v697_v43  ;;  %v1623_v43 = vld [vmem:[%s2654_s7] sm:$0xf]  ;;  %v1833_v44 = vld [vmem:[%s2654_s7 + $0x4] sm:$0xf0] }
 0x132   : > { %1201 = vmatpush.bf16.msrb.mxu0 %v1636_v42 }
 0x133   : > { %v714_v47 = vmax.f32 %v710_v45, 0.0  ;;  %v1832_v45 = vld [vmem:[%s2654_s7 + $0x4] sm:$0xf] }
 0x134   : > { %v670_v48 = vpop.f32.mrf.mxu2 }
 0x135   : > { %v716_v49 = vpack.c.bf16 %v714_v47, %v714_v47  ;;  %v671_v50 = vadd.f32 %v670_v48, %v497_v46  ;;  %v683_v51 = vpop.f32.mrf.mxu3  ;;  %v1624_v46 = vor.u32 %v1833_v44, %v1623_v43  ;;  %v1625_v47 = vld [vmem:[%s2654_s7 + $0x8] sm:$0xf0] }
 0x136   : > { %v698_v52 = vpop.f32.mrf.mxu0  ;;  %v1628_v48 = vor.u32 %v1832_v45, %v1625_v47 }
 0x137   : > { %v684_v53 = vadd.f32 %v683_v51, %v671_v50  ;;  %v711_v54 = vpop.f32.mrf.mxu1  ;;  %936 = vmatmul.bf16.vlgmr.msrb.gmra.mxu3 %v716_v49  ;;  %962 = vmatmul.bf16.vlgmr.msra.gmra.mxu1 %v716_v49  ;;  %v749_v50 = vld [vmem:[%s2653_s6] sm:$0x3] }
 0x138   : > { %1176 = vmatpush.bf16.msra.mxu2 %v1624_v46  ;;  %1202 = vmatpush.bf16.msrb.mxu0 %v1628_v48  ;;  %v752_v51 = vperm.slane %v749_v50, 1 }
 0x139   : > { %v713_v55 = vmax.f32 %v684_v53, 0.0 }
 0x13b   : > { %v715_v56 = vpack.c.bf16 %v713_v55, %v713_v55 }
 0x13c   : > { %v672_v57 = vpop.f32.mrf.mxu2 }
 0x13d   : > { %v685_v58 = vpop.f32.mrf.mxu3  ;;  %923 = vmatmul.bf16.vlgmr.msrb.gmra.mxu2 %v715_v56  ;;  %949 = vmatmul.bf16.vlgmr.msra.gmra.mxu0 %v715_v56  ;;  %v751_v57 = vperm.slane %v749_v50, 0 }
 0x1b4   : > { %v963_v49 = vpop.f32.mrf.mxu1 }
 0x1ba   : > { %v937_v52 = vpop.f32.mrf.mxu3  ;;  %v950_v53 = vpop.f32.mrf.mxu0 }
 0x1bb   : > { %v951_v54 = vadd.f32 %v950_v53, %v752_v51 }
 0x1bc   : > { %v965_v55 = vpop.f32.mrf.mxu1 }
 0x1bd   : > { %v964_v56 = vadd.f32 %v963_v49, %v951_v54 }
 0x1bf   : > { %v968_v58 = vmax.f32 %v964_v56, 0.0 }
 0x1c0   : > { %v924_v59 = vpop.f32.mrf.mxu2 }
 0x1c1   : > { %v970_v60 = vpack.c.bf16 %v968_v58, %v968_v58  ;;  %v925_v61 = vadd.f32 %v924_v59, %v751_v57 }
 0x1c2   : > { %v939_v62 = vpop.f32.mrf.mxu3  ;;  %v952_v63 = vpop.f32.mrf.mxu0 }
 0x1c3   : > { %v938_v0 = vadd.f32 %v937_v52, %v925_v61  ;;  %1190 = vmatmul.bf16.vlgmr.msra.gmra.mxu3 %v970_v60  ;;  %1216 = vmatmul.bf16.vlgmr.msrb.gmra.mxu1 %v970_v60 }
 0x1c5   : > { %v967_v1 = vmax.f32 %v938_v0, 0.0 }
 0x1c7   : > { %v969_v2 = vpack.c.bf16 %v967_v1, %v967_v1 }
 0x1c8   : > { %v926_v3 = vpop.f32.mrf.mxu2 }
 0x1c9   : > { %1177 = vmatmul.bf16.vlgmr.msra.gmra.mxu2 %v969_v2  ;;  %1203 = vmatmul.bf16.vlgmr.msrb.gmra.mxu0 %v969_v2 }
 0x240   : > { %v1217_v4 = vpop.f32.mrf.mxu1 }
 0x246   : > { %v1191_v7 = vpop.f32.mrf.mxu3  ;;  %v1204_v8 = vpop.f32.mrf.mxu0 }
 0x247   : > { %v1205_v9 = vadd.f32 %v1204_v8, %v1006_v6 }
 0x248   : > { %v1219_v10 = vpop.f32.mrf.mxu1 }
 0x249   : > { %v1218_v11 = vadd.f32 %v1217_v4, %v1205_v9 }
 0x24b   : > { %1872 = vtanh.f32 %v1218_v11 }
 0x24c   : > { %v1178_v13 = vpop.f32.mrf.mxu2 }
 0x24d   : > { %v1179_v14 = vadd.f32 %v1178_v13, %v1005_v12 }
 0x24e   : > { %v1193_v15 = vpop.f32.mrf.mxu3  ;;  %v1206_v16 = vpop.f32.mrf.mxu0 }
 0x24f   : > { %v1192_v17 = vadd.f32 %v1191_v7, %v1179_v14 }
 0x251   : > { %v1873_v18 = vpop.eup %1872  ;;  %1236 = vst [vmem:[%s329_s20] sm:$0xff] %v1192_v17 }
 0x252   : > { %v1224_v19 = vadd.f32 1.0, %v1873_v18 }
 0x254   : > { %v1226_v20 = vmul.f32 3.5, %v1224_v19  ;;  %v1180_v21 = vpop.f32.mrf.mxu2 }
 0x256   : > { %v1228_v22 = vadd.f32 -5.0, %v1226_v20 }
 0x258   : > { %1237 = vst [vmem:[%s329_s20 + $0x8] sm:$0xff] %v1228_v22 }
 0x259 PF: > { %s19_s30 = sadd.s32 1, %s1880_s30  }
 0x25a   : > { %p16_p4 = scmp.ge.s32.totalorder %s19_s30, 4  }
 0x25c   :  { %18 = sbr.rel (!%p16_p4) target bundleno = 1 (0x1), region = 86 }

</bundles_post_ra>
